<compile_context>
chip_gen: v7x
topology: tpu7x:2x2x1
jax: 0.10.0
libtpu: 0.0.40
codegen_flags: <defaults>
</compile_context>

<pallas_src>
import functools

import jax
import jax.numpy as jnp
from jax.experimental import pallas as pl
from jax.experimental.pallas import tpu as pltpu


def _round_up(x, m):
    return ((x + m - 1) // m) * m


def mlp_tagger_kernel(ids_ref, fused_ref, b1_ref, w2_ref, b2_ref, o_ref, *,
                      vocab_size, window_size, num_outputs):
    # ids_ref  : (TB, W)        int32  token ids
    # fused_ref: (K_pad, H_pad) f32    flattened per-window (emb @ w1) table
    # b1_ref   : (1, H_pad)     f32
    # w2_ref   : (H_pad, O_pad) f32
    # b2_ref   : (1, O_pad)     f32
    # o_ref    : (TB, O_pad)    f32    log-probs (padded lanes hold garbage)
    ids = ids_ref[...]
    tb = ids.shape[0]
    k_pad = fused_ref.shape[0]

    # Concatenated one-hot over the flattened (window, vocab) axis: lane
    # ids[:, w] + w*V is 1.0.  Exact gather-as-matmul on the MXU.
    iota_k = jax.lax.broadcasted_iota(jnp.int32, (tb, k_pad), 1)
    onehot = jnp.zeros((tb, k_pad), jnp.float32)
    for w in range(window_size):      # static, fully unrolled (W=5); VPU-only
        col = ids[:, w:w + 1] + jnp.int32(w * vocab_size)        # (TB, 1)
        onehot = onehot + (iota_k == col).astype(jnp.float32)

    # Embedding gather + linear1 fused: single K=512 contraction.
    h = jnp.tanh(jnp.dot(onehot, fused_ref[...],
                         preferred_element_type=jnp.float32) + b1_ref[...])
    # (dropout: identity in eval mode)
    logits = jnp.dot(h, w2_ref[...],
                     preferred_element_type=jnp.float32) + b2_ref[...]

    # Mask padded output lanes so they do not pollute the softmax denominator.
    lane = jax.lax.broadcasted_iota(jnp.int32, logits.shape, 1)
    logits = jnp.where(lane < num_outputs, logits, jnp.float32(-1e30))

    # Numerically-stable log_softmax along the last axis.
    m = jnp.max(logits, axis=-1, keepdims=True)
    shifted = logits - m
    lse = jnp.log(jnp.sum(jnp.exp(shifted), axis=-1, keepdims=True))
    o_ref[...] = shifted - lse


def mlp_tagger_forward(token_ids, emb_table, w1, b1, w2, b2, *, batch_tile=None):
    """token_ids: (B, window) int32; returns (B, output_size) f32 log-probs."""
    B, W = token_ids.shape
    V, E = emb_table.shape
    assert w1.shape[0] == W * E, "linear1 expects (window*emb_dim, hidden)"
    H = w1.shape[1]
    O = w2.shape[1]

    # --- Offline algebra: fold the embedding table into linear1 -------------
    # fused[w, v, :] = emb[v] @ w1_r[w]   =>   x_flat @ w1 == onehot @ fused
    w1_r = w1.reshape(W, E, H)
    fused = jnp.einsum("ve,weh->wvh",
                       emb_table.astype(jnp.float32),
                       w1_r.astype(jnp.float32),
                       precision=jax.lax.Precision.HIGHEST)
    fused_flat = fused.reshape(W * V, H)

    # --- Lane/sublane padding: dense MXU tiles, unmasked output stores ------
    K_pad = _round_up(W * V, 128)            # 500 -> 512
    H_pad = _round_up(max(H, 128), 128)      # 32  -> 128
    O_pad = _round_up(max(O, 128), 128)      # 16  -> 128
    fused_p = jnp.zeros((K_pad, H_pad), jnp.float32).at[:W * V, :H].set(fused_flat)
    b1_p = jnp.zeros((1, H_pad), jnp.float32).at[:, :H].set(b1.reshape(1, H))
    w2_p = jnp.zeros((H_pad, O_pad), jnp.float32).at[:H, :O].set(w2)
    b2_p = jnp.zeros((1, O_pad), jnp.float32).at[:, :O].set(b2.reshape(1, O))

    # --- Batch tiling: weights VMEM-resident, batch axis sharded/parallel ---
    if batch_tile is None:
        batch_tile = 512 if B >= 512 else _round_up(B, 8)
    TB = batch_tile
    B_pad = _round_up(B, TB)
    ids_p = jnp.zeros((B_pad, W), jnp.int32).at[:B, :].set(token_ids.astype(jnp.int32))

    kernel = functools.partial(mlp_tagger_kernel, vocab_size=V,
                               window_size=W, num_outputs=O)

    out_p = pl.pallas_call(
        kernel,
        out_shape=jax.ShapeDtypeStruct((B_pad, O_pad), jnp.float32),
        grid_spec=pltpu.PrefetchScalarGridSpec(
            num_scalar_prefetch=0,
            grid=(B_pad // TB,),
            in_specs=[
                pl.BlockSpec((TB, W), lambda i: (i, 0)),
                pl.BlockSpec((K_pad, H_pad), lambda i: (0, 0)),   # resident
                pl.BlockSpec((1, H_pad), lambda i: (0, 0)),       # resident
                pl.BlockSpec((H_pad, O_pad), lambda i: (0, 0)),   # resident
                pl.BlockSpec((1, O_pad), lambda i: (0, 0)),       # resident
            ],
            out_specs=pl.BlockSpec((TB, O_pad), lambda i: (i, 0)),
        ),
        compiler_params=pltpu.CompilerParams(
            dimension_semantics=("parallel",)),
    )(ids_p, fused_p, b1_p, w2_p, b2_p)

    return out_p[:B, :O]


if __name__ == "__main__":
    # Small, deterministic problem consistent with MlpTagger's __init__:
    # vocab_size=100, embedding_dim=50, window_size=5, hidden=32, output=16
    vocab_size = 100
    embedding_dim = 50
    window_size = 5
    hidden_layer_size = 32
    output_size = 16
    batch = 8

    key = jax.random.PRNGKey(0)
    k_emb, k_w1, k_b1, k_w2, k_b2, k_ids = jax.random.split(key, 6)

    emb_table = jax.random.normal(k_emb, (vocab_size, embedding_dim), jnp.float32) * 0.1
    # Linear weights stored as (in_features, out_features)
    w1 = jax.random.normal(k_w1, (embedding_dim * window_size, hidden_layer_size),
                           jnp.float32) * 0.05
    b1 = jax.random.normal(k_b1, (1, hidden_layer_size), jnp.float32) * 0.01
    w2 = jax.random.normal(k_w2, (hidden_layer_size, output_size), jnp.float32) * 0.05
    b2 = jax.random.normal(k_b2, (1, output_size), jnp.float32) * 0.01

    token_ids = jax.random.randint(k_ids, (batch, window_size), 0, vocab_size,
                                   dtype=jnp.int32)

    out = mlp_tagger_forward(token_ids, emb_table, w1, b1, w2, b2)
    out = jax.block_until_ready(out)

    # Sanity: reference in plain JAX (eval-mode forward of the PyTorch module)
    x_ref = emb_table[token_ids].reshape(batch, -1)
    h_ref = jnp.tanh(x_ref @ w1 + b1)
    logits_ref = h_ref @ w2 + b2
    ref = jax.nn.log_softmax(logits_ref, axis=-1)
    assert out.shape == (batch, output_size)
    assert jnp.allclose(out, ref, atol=1e-4, rtol=1e-4)

    print("KERNEL_OK")
</pallas_src>

<mosaic_0001>
module attributes {stable_mosaic.version = 11 : i64} {
  func.func @mlp_tagger_kernel(%arg0: i32, %arg1: memref<8x5xi32, #tpu.memory_space<vmem>>, %arg2: memref<512x128xf32, #tpu.memory_space<vmem>>, %arg3: memref<1x128xf32, #tpu.memory_space<vmem>>, %arg4: memref<128x128xf32, #tpu.memory_space<vmem>>, %arg5: memref<1x128xf32, #tpu.memory_space<vmem>>, %arg6: memref<8x128xf32, #tpu.memory_space<vmem>>) attributes {dimension_semantics = [#tpu.dimension_semantics<parallel>], iteration_bounds = array<i64: 1>, scalar_prefetch = 0 : i64, scratch_operands = 0 : i64, tpu.core_type = #tpu.core_type<tc>, window_params = [{transform_indices = @transform_0, window_bounds = array<i64: 8, 5>}, {pipeline_mode = #tpu.pipeline_mode<synchronous>, transform_indices = @transform_1, window_bounds = array<i64: 512, 128>}, {pipeline_mode = #tpu.pipeline_mode<synchronous>, transform_indices = @transform_2, window_bounds = array<i64: 1, 128>}, {pipeline_mode = #tpu.pipeline_mode<synchronous>, transform_indices = @transform_3, window_bounds = array<i64: 128, 128>}, {pipeline_mode = #tpu.pipeline_mode<synchronous>, transform_indices = @transform_4, window_bounds = array<i64: 1, 128>}, {transform_indices = @transform_5, window_bounds = array<i64: 8, 128>}]} {
    %c0 = arith.constant 0 : index
    %c0_0 = arith.constant 0 : index
    %0 = vector.load %arg1[%c0, %c0_0] : memref<8x5xi32, #tpu.memory_space<vmem>>, vector<8x5xi32>
    %1 = tpu.iota {dimensions = array<i32: 1>} : vector<8x512xi32>
    %cst = arith.constant 0.000000e+00 : f32
    %2 = vector.broadcast %cst : f32 to vector<8x512xf32>
    %3 = vector.extract_strided_slice %0 {offsets = [0, 0], sizes = [8, 1], strides = [1, 1]} : vector<8x5xi32> to vector<8x1xi32>
    %c0_i32 = arith.constant 0 : i32
    %4 = vector.broadcast %c0_i32 : i32 to vector<8x1xi32>
    %5 = arith.addi %3, %4 : vector<8x1xi32>
    %6 = vector.broadcast %5 : vector<8x1xi32> to vector<8x512xi32>
    %7 = arith.cmpi eq, %1, %6 : vector<8x512xi32>
    %8 = arith.extui %7 : vector<8x512xi1> to vector<8x512xi32>
    %9 = arith.sitofp %8 : vector<8x512xi32> to vector<8x512xf32>
    %10 = arith.addf %2, %9 : vector<8x512xf32>
    %11 = vector.extract_strided_slice %0 {offsets = [0, 1], sizes = [8, 1], strides = [1, 1]} : vector<8x5xi32> to vector<8x1xi32>
    %c100_i32 = arith.constant 100 : i32
    %12 = vector.broadcast %c100_i32 : i32 to vector<8x1xi32>
    %13 = arith.addi %11, %12 : vector<8x1xi32>
    %14 = vector.broadcast %13 : vector<8x1xi32> to vector<8x512xi32>
    %15 = arith.cmpi eq, %1, %14 : vector<8x512xi32>
    %16 = arith.extui %15 : vector<8x512xi1> to vector<8x512xi32>
    %17 = arith.sitofp %16 : vector<8x512xi32> to vector<8x512xf32>
    %18 = arith.addf %10, %17 : vector<8x512xf32>
    %19 = vector.extract_strided_slice %0 {offsets = [0, 2], sizes = [8, 1], strides = [1, 1]} : vector<8x5xi32> to vector<8x1xi32>
    %c200_i32 = arith.constant 200 : i32
    %20 = vector.broadcast %c200_i32 : i32 to vector<8x1xi32>
    %21 = arith.addi %19, %20 : vector<8x1xi32>
    %22 = vector.broadcast %21 : vector<8x1xi32> to vector<8x512xi32>
    %23 = arith.cmpi eq, %1, %22 : vector<8x512xi32>
    %24 = arith.extui %23 : vector<8x512xi1> to vector<8x512xi32>
    %25 = arith.sitofp %24 : vector<8x512xi32> to vector<8x512xf32>
    %26 = arith.addf %18, %25 : vector<8x512xf32>
    %27 = vector.extract_strided_slice %0 {offsets = [0, 3], sizes = [8, 1], strides = [1, 1]} : vector<8x5xi32> to vector<8x1xi32>
    %c300_i32 = arith.constant 300 : i32
    %28 = vector.broadcast %c300_i32 : i32 to vector<8x1xi32>
    %29 = arith.addi %27, %28 : vector<8x1xi32>
    %30 = vector.broadcast %29 : vector<8x1xi32> to vector<8x512xi32>
    %31 = arith.cmpi eq, %1, %30 : vector<8x512xi32>
    %32 = arith.extui %31 : vector<8x512xi1> to vector<8x512xi32>
    %33 = arith.sitofp %32 : vector<8x512xi32> to vector<8x512xf32>
    %34 = arith.addf %26, %33 : vector<8x512xf32>
    %35 = vector.extract_strided_slice %0 {offsets = [0, 4], sizes = [8, 1], strides = [1, 1]} : vector<8x5xi32> to vector<8x1xi32>
    %c400_i32 = arith.constant 400 : i32
    %36 = vector.broadcast %c400_i32 : i32 to vector<8x1xi32>
    %37 = arith.addi %35, %36 : vector<8x1xi32>
    %38 = vector.broadcast %37 : vector<8x1xi32> to vector<8x512xi32>
    %39 = arith.cmpi eq, %1, %38 : vector<8x512xi32>
    %40 = arith.extui %39 : vector<8x512xi1> to vector<8x512xi32>
    %41 = arith.sitofp %40 : vector<8x512xi32> to vector<8x512xf32>
    %42 = arith.addf %34, %41 : vector<8x512xf32>
    %c0_1 = arith.constant 0 : index
    %c0_2 = arith.constant 0 : index
    %43 = vector.load %arg2[%c0_1, %c0_2] : memref<512x128xf32, #tpu.memory_space<vmem>>, vector<512x128xf32>
    %cst_3 = arith.constant dense<0.000000e+00> : vector<8x128xf32>
    %44 = tpu.matmul %42, %43, %cst_3 {dimension_numbers = #tpu.dot_dimension_numbers<[1], [0], [0], [1], [0, 0, 1, 1], [], []>} : vector<8x512xf32>, vector<512x128xf32>, vector<8x128xf32> -> vector<8x128xf32>
    %c0_4 = arith.constant 0 : index
    %c0_5 = arith.constant 0 : index
    %45 = vector.load %arg3[%c0_4, %c0_5] : memref<1x128xf32, #tpu.memory_space<vmem>>, vector<1x128xf32>
    %46 = vector.broadcast %45 : vector<1x128xf32> to vector<8x128xf32>
    %47 = arith.addf %44, %46 : vector<8x128xf32>
    %48 = math.tanh %47 : vector<8x128xf32>
    %c0_6 = arith.constant 0 : index
    %c0_7 = arith.constant 0 : index
    %49 = vector.load %arg4[%c0_6, %c0_7] : memref<128x128xf32, #tpu.memory_space<vmem>>, vector<128x128xf32>
    %cst_8 = arith.constant dense<0.000000e+00> : vector<8x128xf32>
    %50 = tpu.matmul %48, %49, %cst_8 {dimension_numbers = #tpu.dot_dimension_numbers<[1], [0], [0], [1], [0, 0, 1, 1], [], []>} : vector<8x128xf32>, vector<128x128xf32>, vector<8x128xf32> -> vector<8x128xf32>
    %c0_9 = arith.constant 0 : index
    %c0_10 = arith.constant 0 : index
    %51 = vector.load %arg5[%c0_9, %c0_10] : memref<1x128xf32, #tpu.memory_space<vmem>>, vector<1x128xf32>
    %52 = vector.broadcast %51 : vector<1x128xf32> to vector<8x128xf32>
    %53 = arith.addf %50, %52 : vector<8x128xf32>
    %54 = tpu.iota {dimensions = array<i32: 1>} : vector<8x128xi32>
    %c16_i32 = arith.constant 16 : i32
    %55 = vector.broadcast %c16_i32 : i32 to vector<8x128xi32>
    %56 = arith.cmpi slt, %54, %55 : vector<8x128xi32>
    %cst_11 = arith.constant -1.000000e+30 : f32
    %57 = vector.broadcast %cst_11 : f32 to vector<8x128xf32>
    %58 = arith.select %56, %53, %57 : vector<8x128xi1>, vector<8x128xf32>
    %cst_12 = arith.constant dense<0xFF800000> : vector<8xf32>
    %59 = vector.multi_reduction <maximumf>, %58, %cst_12 [1] : vector<8x128xf32> to vector<8xf32>
    %60 = vector.shape_cast %59 : vector<8xf32> to vector<8x1xf32>
    %61 = vector.broadcast %60 : vector<8x1xf32> to vector<8x128xf32>
    %62 = arith.subf %58, %61 : vector<8x128xf32>
    %63 = math.exp %62 : vector<8x128xf32>
    %cst_13 = arith.constant dense<0.000000e+00> : vector<8xf32>
    %64 = vector.multi_reduction <add>, %63, %cst_13 [1] : vector<8x128xf32> to vector<8xf32>
    %65 = vector.shape_cast %64 : vector<8xf32> to vector<8x1xf32>
    %66 = math.log %65 : vector<8x1xf32>
    %67 = vector.broadcast %66 : vector<8x1xf32> to vector<8x128xf32>
    %68 = arith.subf %62, %67 : vector<8x128xf32>
    %c0_14 = arith.constant 0 : index
    %c0_15 = arith.constant 0 : index
    %69 = vector.load %arg6[%c0_14, %c0_15] : memref<8x128xf32, #tpu.memory_space<vmem>>, vector<8x128xf32>
    tpu.vector_store %arg6[%c0_14, %c0_15], %68 {strides = array<i32>} : memref<8x128xf32, #tpu.memory_space<vmem>>, vector<8x128xf32>,
    return
  }
  func.func @transform_0(%arg0: i32) -> (i32, i32) {
    %c0_i32 = arith.constant 0 : i32
    %c0_i32_0 = arith.constant 0 : i32
    return %arg0, %c0_i32 : i32, i32
  }
  func.func @transform_1(%arg0: i32) -> (i32, i32) {
    %c0_i32 = arith.constant 0 : i32
    %c0_i32_0 = arith.constant 0 : i32
    %c0_i32_1 = arith.constant 0 : i32
    return %c0_i32, %c0_i32_0 : i32, i32
  }
  func.func @transform_2(%arg0: i32) -> (i32, i32) {
    %c0_i32 = arith.constant 0 : i32
    %c0_i32_0 = arith.constant 0 : i32
    %c0_i32_1 = arith.constant 0 : i32
    return %c0_i32, %c0_i32_0 : i32, i32
  }
  func.func @transform_3(%arg0: i32) -> (i32, i32) {
    %c0_i32 = arith.constant 0 : i32
    %c0_i32_0 = arith.constant 0 : i32
    %c0_i32_1 = arith.constant 0 : i32
    return %c0_i32, %c0_i32_0 : i32, i32
  }
  func.func @transform_4(%arg0: i32) -> (i32, i32) {
    %c0_i32 = arith.constant 0 : i32
    %c0_i32_0 = arith.constant 0 : i32
    %c0_i32_1 = arith.constant 0 : i32
    return %c0_i32, %c0_i32_0 : i32, i32
  }
  func.func @transform_5(%arg0: i32) -> (i32, i32) {
    %c0_i32 = arith.constant 0 : i32
    %c0_i32_0 = arith.constant 0 : i32
    return %arg0, %c0_i32 : i32, i32
  }
}

</mosaic_0001>

<bundles_post_ra>
// kernel: tpu_custom_call.1
= control target key start
LH: loop header
LB: loop body
LE: loop exit
PB: predicated region body
PF: predicated region fallthrough
CT: control target
= control target key end

     0   :  { %10 = vsyncpa [#allocation3], 0  ;;  %s1012_s0 = inlined_call_operand.hbm [shape: s32[8,5], index: 0, kind: input, shape index: {}]   ;;  %s1013_s1 = inlined_call_operand.hbm [shape: f32[512,128], index: 1, kind: input, shape index: {}]   ;;  %s1014_s2 = inlined_call_operand.vmem [shape: f32[1,128], index: 2, kind: input, shape index: {}]   ;;  %s1015_s3 = inlined_call_operand.hbm [shape: f32[128,128], index: 3, kind: input, shape index: {}]   ;;  %s1016_s4 = inlined_call_operand.vmem [shape: f32[1,128], index: 4, kind: input, shape index: {}]   ;;  %s1017_s5 = inlined_call_operand.hbm [shape: f32[8,128], index: 5, kind: output, shape index: {}]  }
   0x1   :  { %11 = vsyncpa [#allocation6], 0 }
   0x2   :  { %12 = vsyncpa [#allocation4], 0  ;;  %s851_s18 = smov [#allocation5]   ;;  %s757_s22 = scalar_lea.hbm %s1013_s1, 8192 }
   0x3   :  { %s28_s19 = sshll.u32 %s851_s18, 4  ;;  %p758_p0 = scmp.ne.s32.totalorder %s1013_s1, %s757_s22  ;;  %s29_s19 = int_to_ptr.vmem [resolvable:$true] %s28_s19 }
   0x4   :  { %p761_p1 = scmp.lt.u32.totalorder %s757_s22, %s1013_s1 }
   0x6   :  { %p763_p2 = pnand %p761_p1, %p758_p0 }
   0x8   :  { %766 = shalt.err (!%p763_p2)
}
   0x9   :  { %s767_s27 = scalar_lea.vmem %s29_s19, 8192  ;;  %p772_p4 = scmp.lt.s32.totalorder %s29_s19, %s29_s19 }
   0xa   :  { %p768_p3 = scmp.ne.s32.totalorder %s29_s19, %s767_s27  ;;  %p773_p5 = scmp.lt.s32.totalorder %s767_s27, %s767_s27 }
   0xc   :  { %p774_p6 = por %p773_p5, %p772_p4 }
   0xe   :  { %p775_p7 = pnand %p774_p6, %p768_p3 }
  0x10   :  { %778 = shalt.err (!%p775_p7)
}
  0x11   :  { %s852_s28 = smov 128   ;;  %s853_s29 = smov 8  }
  0x12   :  { %34 = dma.hbm_to_vmem [thread:$0]  %s1013_s1, 8192, %s29_s19, [#allocation6], %s852_s28, %s852_s28, %s853_s29  }
  0x13   :  { %s854_s7 = smov [#allocation2]   ;;  %s855_s9 = smov [#allocation7]  }
  0x14   :  { %s19_s8 = sshll.u32 %s854_s7, 4  ;;  %s42_s10 = sshll.u32 %s855_s9, 4  ;;  %s20_s8 = int_to_ptr.vmem [resolvable:$true] %s19_s8  ;;  %s43_s10 = int_to_ptr.vmem [resolvable:$true] %s42_s10 }
  0x15   :  { %s779_s13 = scalar_lea.hbm %s1012_s0, 128 }
  0x16   :  { %p780_p8 = scmp.ne.s32.totalorder %s1012_s0, %s779_s13  ;;  %p783_p9 = scmp.lt.u32.totalorder %s779_s13, %s1012_s0 }
  0x18   :  { %p785_p10 = pnand %p783_p9, %p780_p8 }
  0x1a   :  { %788 = shalt.err (!%p785_p10)
}
  0x1b   :  { %s789_s1 = scalar_lea.vmem %s20_s8, 128  ;;  %p794_p12 = scmp.lt.s32.totalorder %s20_s8, %s20_s8 }
  0x1c   :  { %p790_p11 = scmp.ne.s32.totalorder %s20_s8, %s789_s1  ;;  %p795_p13 = scmp.lt.s32.totalorder %s789_s1, %s789_s1 }
  0x1e   :  { %p796_p0 = por %p795_p13, %p794_p12 }
  0x20   :  { %p797_p1 = pnand %p796_p0, %p790_p11 }
  0x22   :  { %800 = shalt.err (!%p797_p1)
}
  0x23   :  { %22 = dma.hbm_to_vmem [thread:$0]  %s1012_s0, 128, %s20_s8, [#allocation3]  }
  0x24   :  { %s801_s22 = scalar_lea.hbm %s1015_s3, 2048 }
  0x25   :  { %p802_p2 = scmp.ne.s32.totalorder %s1015_s3, %s801_s22  ;;  %p805_p3 = scmp.lt.u32.totalorder %s801_s22, %s1015_s3 }
  0x27   :  { %p807_p4 = pnand %p805_p3, %p802_p2 }
  0x29   :  { %810 = shalt.err (!%p807_p4)
}
  0x2a   :  { %s811_s27 = scalar_lea.vmem %s43_s10, 2048  ;;  %p816_p6 = scmp.lt.s32.totalorder %s43_s10, %s43_s10 }
  0x2b   :  { %p812_p5 = scmp.ne.s32.totalorder %s43_s10, %s811_s27  ;;  %p817_p7 = scmp.lt.s32.totalorder %s811_s27, %s811_s27 }
  0x2d   :  { %p818_p8 = por %p817_p7, %p816_p6 }
  0x2f   :  { %p819_p9 = pnand %p818_p8, %p812_p5 }
  0x31   :  { %822 = shalt.err (!%p819_p9)
}
  0x32   :  { %48 = dma.hbm_to_vmem [thread:$0]  %s1015_s3, 2048, %s43_s10, [#allocation6], %s852_s28, %s852_s28, %s853_s29  }
  0x33   :  { %845 = dma.done.wait [#allocation3], 128  }
  0x34   :  { %846 = vsyncadd [#allocation3], 4294967168 }
  0x35   :  { %847 = dma.done.wait [#allocation6], 10240  }
  0x36   :  { %848 = vsyncadd [#allocation6], 4294957056  ;;  %v856_v0 = vmov 0   ;;  %v857_v1 = vmov 2   ;;  %v60_v2 = vld [vmem:[#allocation2] sm:$0xff]  ;;  %v181_v3 = vld [vmem:[#allocation5 + $0x80] sm:$0xff] }
  0x37   :  { %745 = vset.pattern.permute.xlu0 %v856_v0  ;;  %747 = vset.pattern.permute.xlu1 %v857_v1  ;;  %v182_v4 = vld [vmem:[#allocation5 + $0x88] sm:$0xff]  ;;  %v105_v5 = vadd.s32 200, %v60_v2  ;;  %v213_v6 = vld [vmem:[#allocation5 + $0x180] sm:$0xff]  ;;  %v85_v8 = vadd.s32 100, %v60_v2  ;;  %v183_v16 = vld [vmem:[#allocation5 + $0x90] sm:$0xff]  ;;  %v125_v18 = vadd.s32 300, %v60_v2 }
  0x38   :  { %67 = vperm.xlu0 %745, %v60_v2   ;;  %v214_v7 = vld [vmem:[#allocation5 + $0x188] sm:$0xff]  ;;  %v643_v9 = vpack.c.bf16 %v182_v4, %v181_v3  ;;  %v165_v11 = vld [vmem:[#allocation5] sm:$0xff]  ;;  %v184_v17 = vld [vmem:[#allocation5 + $0x98] sm:$0xff]  ;;  %v858_v24 = vmov 1   ;;  %v859_v34 = vmov 3   ;;  %v145_v43 = vadd.s32 400, %v60_v2 }
  0x39   :  { %v675_v10 = vpack.c.bf16 %v214_v7, %v213_v6  ;;  %v166_v12 = vld [vmem:[#allocation5 + $0x8] sm:$0xff]  ;;  %v197_v13 = vld [vmem:[#allocation5 + $0x100] sm:$0xff]  ;;  %107 = vperm.xlu1 %747, %v105_v5   ;;  %v647_v20 = vpack.c.bf16 %v184_v17, %v183_v16  ;;  %v215_v21 = vld [vmem:[#allocation5 + $0x190] sm:$0xff]  ;;  %v860_v57 = vmov 4  }
  0x3a   :  { %v645_v14 = vpack.c.bf16 %v166_v12, %v165_v11  ;;  %v198_v15 = vld [vmem:[#allocation5 + $0x108] sm:$0xff]  ;;  %644 = vmatprep.subr.bf16.mxu0 %v643_v9  ;;  %v216_v22 = vld [vmem:[#allocation5 + $0x198] sm:$0xff]  ;;  %v167_v23 = vld [vmem:[#allocation5 + $0x10] sm:$0xff] }
  0x3b   :  { %676 = vmatprep.subr.bf16.mxu1 %v675_v10  ;;  %v677_v19 = vpack.c.bf16 %v198_v15, %v197_v13  ;;  %v679_v25 = vpack.c.bf16 %v216_v22, %v215_v21  ;;  %v168_v26 = vld [vmem:[#allocation5 + $0x18] sm:$0xff]  ;;  %v199_v27 = vld [vmem:[#allocation5 + $0x110] sm:$0xff]  ;;  %v185_v31 = vld [vmem:[#allocation5 + $0xa0] sm:$0xff] }
  0x3c   :  { %746 = vset.pattern.permute.xlu0 %v858_v24  ;;  %646 = vmatpush3.bf16.msra.mxu0 %v645_v14  ;;  %v200_v28 = vld [vmem:[#allocation5 + $0x118] sm:$0xff]  ;;  %v649_v29 = vpack.c.bf16 %v168_v26, %v167_v23  ;;  %v186_v32 = vld [vmem:[#allocation5 + $0xa8] sm:$0xff]  ;;  %v217_v33 = vld [vmem:[#allocation5 + $0x1a0] sm:$0xff] }
  0x3d   :  { %87 = vperm.xlu0 %746, %v85_v8   ;;  %678 = vmatpush3.bf16.msra.mxu1 %v677_v19  ;;  %v681_v30 = vpack.c.bf16 %v200_v28, %v199_v27  ;;  %v651_v35 = vpack.c.bf16 %v186_v32, %v185_v31  ;;  %v218_v36 = vld [vmem:[#allocation5 + $0x1a8] sm:$0xff]  ;;  %v169_v37 = vld [vmem:[#allocation5 + $0x20] sm:$0xff]  ;;  %v187_v42 = vld [vmem:[#allocation5 + $0xb0] sm:$0xff] }
  0x3e   :  { %748 = vset.pattern.permute.xlu1 %v859_v34  ;;  %648 = vmatprep.subr.bf16.mxu0 %v647_v20  ;;  %v170_v38 = vld [vmem:[#allocation5 + $0x28] sm:$0xff]  ;;  %v683_v39 = vpack.c.bf16 %v218_v36, %v217_v33  ;;  %v201_v40 = vld [vmem:[#allocation5 + $0x120] sm:$0xff]  ;;  %v188_v45 = vld [vmem:[#allocation5 + $0xb8] sm:$0xff] }
  0x3f   :  { %127 = vperm.xlu1 %748, %v125_v18   ;;  %680 = vmatprep.subr.bf16.mxu1 %v679_v25  ;;  %v202_v41 = vld [vmem:[#allocation5 + $0x128] sm:$0xff]  ;;  %v653_v44 = vpack.c.bf16 %v170_v38, %v169_v37  ;;  %v219_v46 = vld [vmem:[#allocation5 + $0x1b0] sm:$0xff]  ;;  %v220_v47 = vld [vmem:[#allocation5 + $0x1b8] sm:$0xff]  ;;  %v655_v49 = vpack.c.bf16 %v188_v45, %v187_v42  ;;  %v861_v42 = vmov 0.0|0.0  }
  0x40   :  { %650 = vmatpush3.bf16.msra.mxu0 %v649_v29  ;;  %v685_v48 = vpack.c.bf16 %v202_v41, %v201_v40  ;;  %v171_v50 = vld [vmem:[#allocation5 + $0x30] sm:$0xff]  ;;  %v172_v51 = vld [vmem:[#allocation5 + $0x38] sm:$0xff]  ;;  %v687_v53 = vpack.c.bf16 %v220_v47, %v219_v46  ;;  %v189_v55 = vld [vmem:[#allocation5 + $0xc0] sm:$0xff] }
  0x41   :  { %682 = vmatpush3.bf16.msra.mxu1 %v681_v30  ;;  %652 = vmatprep.subr.bf16.mxu0 %v651_v35  ;;  %v203_v52 = vld [vmem:[#allocation5 + $0x130] sm:$0xff]  ;;  %v204_v54 = vld [vmem:[#allocation5 + $0x138] sm:$0xff]  ;;  %v190_v56 = vld [vmem:[#allocation5 + $0xc8] sm:$0xff]  ;;  %v657_v60 = vpack.c.bf16 %v172_v51, %v171_v50 }
  0x42   :  { %684 = vmatprep.subr.bf16.mxu1 %v683_v39  ;;  %750 = vset.pattern.permute.xlu0 %v860_v57  ;;  %v221_v58 = vld [vmem:[#allocation5 + $0x1c0] sm:$0xff]  ;;  %v222_v59 = vld [vmem:[#allocation5 + $0x1c8] sm:$0xff]  ;;  %v689_v61 = vpack.c.bf16 %v204_v54, %v203_v52  ;;  %v659_v62 = vpack.c.bf16 %v190_v56, %v189_v55  ;;  %v191_v4 = vld [vmem:[#allocation5 + $0xd0] sm:$0xff] }
  0x43   :  { %749 = vset.pattern.permute.xlu1 %v860_v57  ;;  %v173_v63 = vld [vmem:[#allocation5 + $0x40] sm:$0xff]  ;;  %v174_v0 = vld [vmem:[#allocation5 + $0x48] sm:$0xff]  ;;  %v691_v2 = vpack.c.bf16 %v222_v59, %v221_v58  ;;  %v192_v5 = vld [vmem:[#allocation5 + $0xd8] sm:$0xff] }
  0x44   :  { %147 = vperm.xlu1 %749, %v145_v43   ;;  %654 = vmatpush3.bf16.msra.mxu0 %v653_v44  ;;  %v205_v1 = vld [vmem:[#allocation5 + $0x140] sm:$0xff]  ;;  %v206_v3 = vld [vmem:[#allocation5 + $0x148] sm:$0xff]  ;;  %v223_v6 = vld [vmem:[#allocation5 + $0x1d0] sm:$0xff]  ;;  %v661_v8 = vpack.c.bf16 %v174_v0, %v173_v63  ;;  %v663_v10 = vpack.c.bf16 %v192_v5, %v191_v4  ;;  %v61_v43 = vlaneseq }
  0x45   :  { %686 = vmatpush3.bf16.msra.mxu1 %v685_v48  ;;  %656 = vmatprep.subr.bf16.mxu0 %v655_v49  ;;  %v224_v7 = vld [vmem:[#allocation5 + $0x1d8] sm:$0xff]  ;;  %v693_v9 = vpack.c.bf16 %v206_v3, %v205_v1  ;;  %v175_v11 = vld [vmem:[#allocation5 + $0x50] sm:$0xff]  ;;  %v193_v16 = vld [vmem:[#allocation5 + $0xe0] sm:$0xff] }
  0x46   :  { %688 = vmatprep.subr.bf16.mxu1 %v687_v53  ;;  %v176_v12 = vld [vmem:[#allocation5 + $0x58] sm:$0xff]  ;;  %v207_v13 = vld [vmem:[#allocation5 + $0x150] sm:$0xff]  ;;  %v695_v14 = vpack.c.bf16 %v224_v7, %v223_v6  ;;  %v194_v17 = vld [vmem:[#allocation5 + $0xe8] sm:$0xff]  ;;  %v938_v44 = vand.u32 127, %v61_v43  ;;  %v862_v53 = vmov 0.0  }
  0x47   :  { %v208_v15 = vld [vmem:[#allocation5 + $0x158] sm:$0xff]  ;;  %v225_v18 = vld [vmem:[#allocation5 + $0x1e0] sm:$0xff]  ;;  %v226_v19 = vld [vmem:[#allocation5 + $0x1e8] sm:$0xff]  ;;  %v665_v20 = vpack.c.bf16 %v176_v12, %v175_v11  ;;  %v667_v22 = vpack.c.bf16 %v194_v17, %v193_v16 }
  0x48   :  { %658 = vmatpush3.bf16.msra.mxu0 %v657_v60  ;;  %v697_v21 = vpack.c.bf16 %v208_v15, %v207_v13  ;;  %v177_v23 = vld [vmem:[#allocation5 + $0x60] sm:$0xff]  ;;  %v178_v24 = vld [vmem:[#allocation5 + $0x68] sm:$0xff]  ;;  %v699_v26 = vpack.c.bf16 %v226_v19, %v225_v18  ;;  %v195_v28 = vld [vmem:[#allocation5 + $0xf0] sm:$0xff]  ;;  %v63_v45 = vadd.s32 128, %v938_v44  ;;  %v942_v46 = vadd.s32 256, %v938_v44 }
  0x49   :  { %690 = vmatpush3.bf16.msra.mxu1 %v689_v61  ;;  %660 = vmatprep.subr.bf16.mxu0 %v659_v62  ;;  %v209_v25 = vld [vmem:[#allocation5 + $0x160] sm:$0xff]  ;;  %v210_v27 = vld [vmem:[#allocation5 + $0x168] sm:$0xff]  ;;  %v196_v29 = vld [vmem:[#allocation5 + $0xf8] sm:$0xff]  ;;  %v669_v32 = vpack.c.bf16 %v178_v24, %v177_v23  ;;  %v65_v47 = vadd.s32 384, %v938_v44 }
  0x4a   :  { %692 = vmatprep.subr.bf16.mxu1 %v691_v2  ;;  %v227_v30 = vld [vmem:[#allocation5 + $0x1f0] sm:$0xff]  ;;  %v228_v31 = vld [vmem:[#allocation5 + $0x1f8] sm:$0xff]  ;;  %v701_v33 = vpack.c.bf16 %v210_v27, %v209_v25  ;;  %v671_v34 = vpack.c.bf16 %v196_v29, %v195_v28  ;;  %v945_v49 = vld [vmem:[#allocation7] sm:$0xff] }
  0x4b   :  { %v179_v35 = vld [vmem:[#allocation5 + $0x70] sm:$0xff]  ;;  %v180_v36 = vld [vmem:[#allocation5 + $0x78] sm:$0xff]  ;;  %v703_v37 = vpack.c.bf16 %v228_v31, %v227_v30  ;;  %v947_v50 = vld [vmem:[#allocation7 + $0x8] sm:$0xff] }
  0x4c   :  { %662 = vmatpush3.bf16.msra.mxu0 %v661_v8  ;;  %v211_v38 = vld [vmem:[#allocation5 + $0x170] sm:$0xff]  ;;  %v212_v39 = vld [vmem:[#allocation5 + $0x178] sm:$0xff]  ;;  %v673_v40 = vpack.c.bf16 %v180_v36, %v179_v35  ;;  %v708_v52 = vpack.c.bf16 %v947_v50, %v945_v49 }
  0x4d   :  { %694 = vmatpush3.bf16.msra.mxu1 %v693_v9  ;;  %664 = vmatprep.subr.bf16.mxu0 %v663_v10  ;;  %v705_v41 = vpack.c.bf16 %v212_v39, %v211_v38  ;;  %v379_v28 = vld [vmem:[#allocation7 + $0x10] sm:$0xff]  ;;  %v380_v29 = vld [vmem:[#allocation7 + $0x18] sm:$0xff]  ;;  %v385_v38 = vld [vmem:[#allocation7 + $0x40] sm:$0xff] }
  0x4e   :  { %696 = vmatprep.subr.bf16.mxu1 %v695_v14  ;;  %v711_v31 = vpack.c.bf16 %v380_v29, %v379_v28  ;;  %v383_v35 = vld [vmem:[#allocation7 + $0x30] sm:$0xff]  ;;  %v384_v36 = vld [vmem:[#allocation7 + $0x38] sm:$0xff]  ;;  %v386_v39 = vld [vmem:[#allocation7 + $0x48] sm:$0xff] }
  0x4f   :  { %v388_v43 = vld [vmem:[#allocation7 + $0x58] sm:$0xff]  ;;  %v391_v49 = vld [vmem:[#allocation7 + $0x70] sm:$0xff] }
  0x50   :  { %666 = vmatpush3.bf16.msra.mxu0 %v665_v20  ;;  %v392_v50 = vld [vmem:[#allocation7 + $0x78] sm:$0xff] }
  0x51   :  { %698 = vmatpush3.bf16.msra.mxu1 %v697_v21  ;;  %668 = vmatprep.subr.bf16.mxu0 %v667_v22 }
  0x52   :  { %700 = vmatprep.subr.bf16.mxu1 %v699_v26 }
  0x54   :  { %670 = vmatpush3.bf16.msra.mxu0 %v669_v32  ;;  %v381_v32 = vld [vmem:[#allocation7 + $0x20] sm:$0xff] }
  0x55   :  { %702 = vmatpush3.bf16.msra.mxu1 %v701_v33  ;;  %672 = vmatprep.subr.bf16.mxu0 %v671_v34  ;;  %v382_v33 = vld [vmem:[#allocation7 + $0x28] sm:$0xff] }
  0x56   :  { %704 = vmatprep.subr.bf16.mxu1 %v703_v37  ;;  %v714_v34 = vpack.c.bf16 %v382_v33, %v381_v32  ;;  %v717_v37 = vpack.c.bf16 %v384_v36, %v383_v35 }
  0x58   :  { %674 = vmatpush3.bf16.msra.mxu0 %v673_v40  ;;  %v720_v40 = vpack.c.bf16 %v386_v39, %v385_v38 }
  0x59   :  { %706 = vmatpush3.bf16.msra.mxu1 %v705_v41  ;;  %707 = vmatprep.subr.bf16.mxu0 %v861_v42  ;;  %v387_v41 = vld [vmem:[#allocation7 + $0x50] sm:$0xff] }
  0xb7   :  { %v68_v48 = vpop.permute.xlu0 %67 }
  0xb8   :  { %vm69_vm0 = vcmp.eq.s32.totalorder %v938_v44, %v68_v48  ;;  %vm70_vm1 = vcmp.eq.s32.totalorder %v63_v45, %v68_v48  ;;  %vm71_vm2 = vcmp.eq.s32.totalorder %v942_v46, %v68_v48  ;;  %vm72_vm3 = vcmp.eq.s32.totalorder %v65_v47, %v68_v48  ;;  %v108_v51 = vpop.permute.xlu1 %107 }
  0xb9   :  { %vm109_vm4 = vcmp.eq.s32.totalorder %v938_v44, %v108_v51  ;;  %v499_v54 = vsel %vm69_vm0, 1.0, %v862_v53  ;;  %v500_v55 = vsel %vm70_vm1, 1.0, %v862_v53  ;;  %v501_v56 = vsel %vm71_vm2, 1.0, %v862_v53 }
  0xba   :  { %v502_v57 = vsel %vm72_vm3, 1.0, %v862_v53  ;;  %vm110_vm5 = vcmp.eq.s32.totalorder %v63_v45, %v108_v51  ;;  %vm111_vm6 = vcmp.eq.s32.totalorder %v942_v46, %v108_v51  ;;  %vm112_vm7 = vcmp.eq.s32.totalorder %v65_v47, %v108_v51 }
  0xbb   :  { %v507_v58 = vsel %vm109_vm4, 1.0, %v862_v53  ;;  %v509_v3 = vsel %vm111_vm6, 1.0, %v862_v53  ;;  %v508_v5 = vsel %vm110_vm5, 1.0, %v862_v53  ;;  %v510_v7 = vsel %vm112_vm7, 1.0, %v862_v53 }
  0xbc   :  { %v88_v59 = vpop.permute.xlu0 %87  ;;  %vm863_vm4 = vmmov 0   ;;  %v729_v51 = vpack.c.bf16 %v392_v50, %v391_v49  ;;  %vm470_vm5 = vcmp.lt.s32.totalorder %v938_v44, 16 }
  0xbd   :  { %vm89_vm8 = vcmp.eq.s32.totalorder %v938_v44, %v88_v59  ;;  %vm90_vm9 = vcmp.eq.s32.totalorder %v63_v45, %v88_v59  ;;  %vm91_vm10 = vcmp.eq.s32.totalorder %v942_v46, %v88_v59  ;;  %vm92_vm11 = vcmp.eq.s32.totalorder %v65_v47, %v88_v59 }
  0xbe   :  { %v503_v60 = vsel %vm89_vm8, 1.0, %v862_v53  ;;  %v504_v61 = vsel %vm90_vm9, 1.0, %v862_v53  ;;  %v505_v62 = vsel %vm91_vm10, 1.0, %v862_v53  ;;  %v506_v63 = vsel %vm92_vm11, 1.0, %v862_v53  ;;  %v128_v0 = vpop.permute.xlu1 %127 }
  0xbf   :  { %v101_v1 = vadd.f32 %v503_v60, %v499_v54  ;;  %v103_v2 = vadd.f32 %v505_v62, %v501_v56  ;;  %vm129_vm12 = vcmp.eq.s32.totalorder %v938_v44, %v128_v0  ;;  %vm131_vm13 = vcmp.eq.s32.totalorder %v942_v46, %v128_v0 }
  0xc0   :  { %v102_v4 = vadd.f32 %v504_v61, %v500_v55  ;;  %vm130_vm14 = vcmp.eq.s32.totalorder %v63_v45, %v128_v0  ;;  %v104_v6 = vadd.f32 %v506_v63, %v502_v57  ;;  %vm132_vm15 = vcmp.eq.s32.totalorder %v65_v47, %v128_v0  ;;  %v519_v55 = vld [vmem:[%s1014_s2] ss:$0 sm:$0xff]  ;;  %s864_s2 = smov [#allocation8]  }
  0xc1   :  { %v121_v8 = vadd.f32 %v507_v58, %v101_v1  ;;  %v511_v9 = vsel %vm129_vm12, 1.0, %v862_v53  ;;  %v513_v10 = vsel %vm131_vm13, 1.0, %v862_v53  ;;  %v123_v12 = vadd.f32 %v509_v3, %v103_v2  ;;  %s489_s7 = sshll.u32 %s864_s2, 4  ;;  %s490_s7 = int_to_ptr.vmem [resolvable:$true] %s489_s7 }
  0xc2   :  { %v122_v11 = vadd.f32 %v508_v5, %v102_v4  ;;  %v512_v14 = vsel %vm130_vm14, 1.0, %v862_v53  ;;  %v124_v15 = vadd.f32 %v510_v7, %v104_v6  ;;  %v514_v16 = vsel %vm132_vm15, 1.0, %v862_v53  ;;  %p828_p11 = scmp.lt.s32.totalorder %s490_s7, %s490_s7 }
  0xc3   :  { %v148_v13 = vpop.permute.xlu1 %147  ;;  %v141_v17 = vadd.f32 %v511_v9, %v121_v8  ;;  %v143_v25 = vadd.f32 %v513_v10, %v123_v12 }
  0xc4   :  { %vm149_vm0 = vcmp.eq.s32.totalorder %v938_v44, %v148_v13  ;;  %vm151_vm1 = vcmp.eq.s32.totalorder %v942_v46, %v148_v13  ;;  %v142_v18 = vadd.f32 %v512_v14, %v122_v11  ;;  %vm150_vm2 = vcmp.eq.s32.totalorder %v63_v45, %v148_v13  ;;  %v389_v45 = vld [vmem:[#allocation7 + $0x60] sm:$0xff] }
  0xc5   :  { %v516_v19 = vsel %vm150_vm2, 1.0, %v862_v53  ;;  %v144_v20 = vadd.f32 %v514_v16, %v124_v15  ;;  %vm152_vm3 = vcmp.eq.s32.totalorder %v65_v47, %v148_v13  ;;  %v515_v21 = vsel %vm149_vm0, 1.0, %v862_v53  ;;  %v390_v47 = vld [vmem:[#allocation7 + $0x68] sm:$0xff] }
  0xc6   :  { %v162_v22 = vadd.f32 %v516_v19, %v142_v18  ;;  %v518_v23 = vsel %vm152_vm3, 1.0, %v862_v53  ;;  %v161_v24 = vadd.f32 %v515_v21, %v141_v17  ;;  %v517_v27 = vsel %vm151_vm1, 1.0, %v862_v53 }
  0xc7   :  { %v164_v26 = vadd.f32 %v518_v23, %v144_v20  ;;  %v163_v30 = vadd.f32 %v517_v27, %v143_v25  ;;  %v723_v46 = vpack.c.bf16 %v388_v43, %v387_v41  ;;  %v726_v48 = vpack.c.bf16 %v390_v47, %v389_v45 }
  0xc8   :  { %300 = vmatprep.mubr.f32.mxu0 %v162_v22 }
  0xc9   :  { %370 = vmatprep.mubr.f32.mxu1 %v164_v26  ;;  %301 = vmatmul.mubr.f32.vlgmr.msra.gmra.mrb[0].mxu0 %v161_v24 }
  0xca   :  { %371 = vmatmul.mubr.f32.vlgmr.msra.gmra.mrb[0].mxu1 %v163_v30  ;;  %709 = vmatpush3.bf16.msra.mxu0 %v708_v52 }
  0xcb   :  { %710 = vmatprep.subr.bf16.mxu0 %v861_v42  ;;  %640 = vmatprep.mubr.msk.f32.mxu0 %vm863_vm4, %v862_v53 }
  0xce   :  { %712 = vmatpush3.bf16.msra.mxu0 %v711_v31 }
  0xcf   :  { %713 = vmatprep.subr.bf16.mxu0 %v861_v42 }
  0xd2   :  { %715 = vmatpush3.bf16.msra.mxu0 %v714_v34 }
  0xd3   :  { %716 = vmatprep.subr.bf16.mxu0 %v861_v42 }
  0xd6   :  { %718 = vmatpush3.bf16.msra.mxu0 %v717_v37 }
  0xd7   :  { %719 = vmatprep.subr.bf16.mxu0 %v861_v42 }
  0xda   :  { %721 = vmatpush3.bf16.msra.mxu0 %v720_v40 }
  0xdb   :  { %722 = vmatprep.subr.bf16.mxu0 %v861_v42 }
  0xde   :  { %724 = vmatpush3.bf16.msra.mxu0 %v723_v46 }
  0xdf   :  { %725 = vmatprep.subr.bf16.mxu0 %v861_v42 }
  0xe2   :  { %727 = vmatpush3.bf16.msra.mxu0 %v726_v48 }
  0xe3   :  { %728 = vmatprep.subr.bf16.mxu0 %v861_v42  ;;  %v520_v42 = vld [vmem:[%s1016_s4] ss:$0 sm:$0xff]  ;;  %s823_s4 = scalar_lea.vmem %s490_s7, 128 }
  0xe4   :  { %p824_p10 = scmp.ne.s32.totalorder %s490_s7, %s823_s4  ;;  %p829_p12 = scmp.lt.s32.totalorder %s823_s4, %s823_s4 }
  0xe6   :  { %730 = vmatpush3.bf16.msra.mxu0 %v729_v51  ;;  %p830_p13 = por %p829_p12, %p828_p11 }
  0xe8   :  { %p831_p0 = pnand %p830_p13, %p824_p10 }
 0x19c   :  { %v553_v52 = vpop.f32.mrb[0].mxu0 }
 0x19d   :  { %v588_v54 = vpop.f32.mrb[0].mxu1  ;;  %v554_v56 = vpop.f32.mrb[1].mxu0 }
 0x19e   :  { %v555_v57 = vadd.f32 %v554_v56, %v553_v52  ;;  %v589_v53 = vpop.f32.mrb[1].mxu1 }
 0x19f   :  { %v590_v58 = vadd.f32 %v589_v53, %v588_v54 }
 0x1a0   :  { %v303_v59 = vadd.f32 %v555_v57, %v519_v55 }
 0x1a2   :  { %v373_v60 = vadd.f32 %v590_v58, %v303_v59 }
 0x1a4   :  { %751 = vtanh.f32 %v373_v60 }
 0x1ae   :  { %v752_v61 = vpop.eup %751 }
 0x1af   :  { %641 = vmatmul.mubr.f32.vlgmr.msra.gmra.mrb[2].mxu0 %v752_v61 }
 0x282   :  { %v466_v62 = vpop.f32.mrb[2].mxu0 }
 0x283   :  { %v467_v63 = vadd.f32 %v520_v42, %v466_v62  ;;  %v642_v0 = vpop.f32.mrb[3].mxu0 }
 0x285   :  { %v471_v1 = vsel %vm470_vm5, %v467_v63, -1e+30 }
 0x286   :  { %472 = vmax.xlane.f32.xlu0 %v471_v1 }
 0x313   :  { %v473_v2 = vpop.xlane.xlu0 %472 }
 0x314   :  { %v474_v3 = vsub.f32 %v471_v1, %v473_v2 }
 0x316   :  { %v475_v4 = vmul.f32 1.442695, %v474_v3 }
 0x318   :  { %753 = vpow2.f32 %v475_v4 }
 0x322   :  { %v754_v5 = vpop.eup %753 }
 0x323   :  { %477 = vadd.xlane.f32.xlu1 %v754_v5 }
 0x3b0   :  { %v478_v6 = vpop.xlane.xlu1 %477 }
 0x3b1   :  { %755 = vlog2.f32 %v478_v6 }
 0x3bb   :  { %v756_v7 = vpop.eup %755 }
 0x3bc   :  { %v480_v8 = vmul.f32 0.6931472, %v756_v7 }
 0x3be   :  { %v481_v9 = vsub.f32 %v474_v3, %v480_v8 }
 0x3c0   :  { %482 = vst [vmem:[#allocation8] sm:$0xff] %v481_v9 }
 0x3c1   :  { %834 = shalt.err (!%p831_p0)
}
 0x3c2   :  { %s835_s10 = scalar_lea.hbm %s1017_s5, 128 }
 0x3c3   :  { %p836_p1 = scmp.ne.s32.totalorder %s1017_s5, %s835_s10  ;;  %p839_p2 = scmp.lt.u32.totalorder %s835_s10, %s1017_s5 }
 0x3c5   :  { %p841_p3 = pnand %p839_p2, %p836_p1 }
 0x3c7   :  { %844 = shalt.err (!%p841_p3)
}
 0x3c8   :  { %492 = dma.vmem_to_hbm [thread:$0]  %s490_s7, 128, %s1017_s5, [#allocation4]  }
 0x3c9   :  { %849 = dma.done.wait [#allocation4], 128  }
 0x3ca   :  { %850 = vsyncadd [#allocation4], 4294967168 }
 0x3cb   :  { %496 = vsyncpa [#allocation3], 1 }
 0x3cc   :  { %497 = vsyncpa [#allocation6], 1 }
 0x3cd   :  { %498 = vsyncpa [#allocation4], 1 }

</bundles_post_ra>
